<compile_context>
chip_gen: v7x
topology: tpu7x:2x2x1
jax: 0.10.0
libtpu: 0.0.40
codegen_flags: <defaults>
</compile_context>

<pallas_src>
import jax
import jax.numpy as jnp
from jax.experimental import pallas as pl
from jax.experimental.pallas import tpu as pltpu


def linear_kernel(x_ref, wt_ref, b_ref, o_ref):
    # x_ref: (tm, K)   wt_ref: (K, tn)   b_ref: (1, tn)   o_ref: (tm, tn)
    # Contraction already laid out for the MXU (weight pre-transposed in
    # parameter setup); accumulate in f32, add bias (row broadcast), cast.
    y = jnp.dot(x_ref[...], wt_ref[...], preferred_element_type=jnp.float32)
    o_ref[...] = (y + b_ref[...]).astype(o_ref.dtype)


def _round_up(v: int, m: int) -> int:
    return ((v + m - 1) // m) * m


def prepare_linear_params(weight, bias):
    """One-time (hoisted) parameter layout: nn.Linear stores weight as
    (OUT, IN); the kernel wants (IN, OUT) plus a (1, OUT) bias row."""
    return weight.T, bias.reshape(1, -1)


def linear_pallas(x, w_t, b_row):
    """y = x @ w_t + b_row  (nn.Linear semantics with pre-transposed weight).

    x: (B, IN) f32, w_t: (IN, OUT) f32, b_row: (1, OUT) f32 -> (B, OUT) f32.
    """
    B, IN = x.shape
    OUT = w_t.shape[1]

    # ---- Small-shape fast path: one full block, no grid, no padding. ----
    # Block dims equal to the full array dims satisfy the (8,128) rule, and
    # at this size masked stores are negligible next to extra HLO ops.
    if B <= 512 and OUT <= 512:
        return pl.pallas_call(
            linear_kernel,
            out_shape=jax.ShapeDtypeStruct((B, OUT), x.dtype),
        )(x, w_t, b_row)

    # ---- Tiled path for scaled-up shapes (HBM-bandwidth bound, K tiny). ----
    tm = min(512, _round_up(B, 8))       # big row tiles -> near HBM roofline
    tn = min(256, _round_up(OUT, 128))   # fill the 256-wide MXU on v6e/v7x
    B_pad = _round_up(B, tm)
    N_pad = _round_up(OUT, tn)

    # Pad only when actually needed (no zero-width pad HLOs); K is never padded.
    x_p = x if B_pad == B else jnp.pad(x, ((0, B_pad - B), (0, 0)))
    w_p = w_t if N_pad == OUT else jnp.pad(w_t, ((0, 0), (0, N_pad - OUT)))
    b_p = b_row if N_pad == OUT else jnp.pad(b_row, ((0, 0), (0, N_pad - OUT)))

    grid = (B_pad // tm, N_pad // tn)

    out_p = pl.pallas_call(
        linear_kernel,
        out_shape=jax.ShapeDtypeStruct((B_pad, N_pad), x.dtype),
        grid_spec=pl.GridSpec(
            grid=grid,
            in_specs=[
                pl.BlockSpec((tm, IN), lambda i, j: (i, 0)),
                pl.BlockSpec((IN, tn), lambda i, j: (0, j)),
                pl.BlockSpec((1, tn), lambda i, j: (0, j)),
            ],
            out_specs=pl.BlockSpec((tm, tn), lambda i, j: (i, j)),
        ),
        compiler_params=pltpu.CompilerParams(
            dimension_semantics=("parallel", "parallel"),
        ),
    )(x_p, w_p, b_p)

    if B_pad != B or N_pad != OUT:
        out_p = out_p[:B, :OUT]
    return out_p


if __name__ == "__main__":
    key = jax.random.PRNGKey(0)
    kx, kw, kb = jax.random.split(key, 3)

    B, IN_FEATURES, OUT_FEATURES = 8, 2, 4

    # Deterministic parameter init (mimics nn.Linear's uniform fan-in init).
    bound = 1.0 / (IN_FEATURES ** 0.5)
    weight = jax.random.uniform(
        kw, (OUT_FEATURES, IN_FEATURES), jnp.float32, -bound, bound
    )
    bias = jax.random.uniform(kb, (OUT_FEATURES,), jnp.float32, -bound, bound)

    x = jax.random.normal(kx, (B, IN_FEATURES), jnp.float32)

    # Hoisted, one-time parameter layout (not part of the per-call hot path).
    w_t, b_row = prepare_linear_params(weight, bias)

    out = linear_pallas(x, w_t, b_row)
    jax.block_until_ready(out)

    # Correctness check against plain JAX reference.
    ref = x @ weight.T + bias
    assert out.shape == (B, OUT_FEATURES)
    assert jnp.allclose(out, ref, atol=1e-5, rtol=1e-5)

    print("KERNEL_OK")
</pallas_src>

<mosaic_0001>
module attributes {stable_mosaic.version = 11 : i64} {
  func.func @linear_kernel(%arg0: memref<8x2xf32, #tpu.memory_space<vmem>>, %arg1: memref<2x4xf32, #tpu.memory_space<vmem>>, %arg2: memref<1x4xf32, #tpu.memory_space<vmem>>, %arg3: memref<8x4xf32, #tpu.memory_space<vmem>>) attributes {dimension_semantics = [], scalar_prefetch = 0 : i64, scratch_operands = 0 : i64, tpu.core_type = #tpu.core_type<tc>} {
    %c0 = arith.constant 0 : index
    %c0_0 = arith.constant 0 : index
    %0 = vector.load %arg0[%c0, %c0_0] : memref<8x2xf32, #tpu.memory_space<vmem>>, vector<8x2xf32>
    %c0_1 = arith.constant 0 : index
    %c0_2 = arith.constant 0 : index
    %1 = vector.load %arg1[%c0_1, %c0_2] : memref<2x4xf32, #tpu.memory_space<vmem>>, vector<2x4xf32>
    %cst = arith.constant dense<0.000000e+00> : vector<8x4xf32>
    %2 = tpu.matmul %0, %1, %cst {dimension_numbers = #tpu.dot_dimension_numbers<[1], [0], [0], [1], [0, 0, 1, 1], [], []>} : vector<8x2xf32>, vector<2x4xf32>, vector<8x4xf32> -> vector<8x4xf32>
    %c0_3 = arith.constant 0 : index
    %c0_4 = arith.constant 0 : index
    %3 = vector.load %arg2[%c0_3, %c0_4] : memref<1x4xf32, #tpu.memory_space<vmem>>, vector<1x4xf32>
    %4 = vector.broadcast %3 : vector<1x4xf32> to vector<8x4xf32>
    %5 = arith.addf %2, %4 : vector<8x4xf32>
    %c0_5 = arith.constant 0 : index
    %c0_6 = arith.constant 0 : index
    %6 = vector.load %arg3[%c0_5, %c0_6] : memref<8x4xf32, #tpu.memory_space<vmem>>, vector<8x4xf32>
    tpu.vector_store %arg3[%c0_5, %c0_6], %5 {strides = array<i32>} : memref<8x4xf32, #tpu.memory_space<vmem>>, vector<8x4xf32>,
    return
  }
}

</mosaic_0001>

<bundles_post_ra>
// kernel: tpu_custom_call.1
= control target key start
LH: loop header
LB: loop body
LE: loop exit
PB: predicated region body
PF: predicated region fallthrough
CT: control target
= control target key end

     0   :  { %vm27_vm0 = vcmask 1041408   ;;  %vm23_vm1 = vcmask 15360   ;;  %v119_v0 = vmov 0.0   ;;  %vm120_vm2 = vmmov 0   ;;  %s153_s1 = inlined_call_operand.vmem [shape: f32[2,4], index: 1, kind: input, shape index: {}]   ;;  %s154_s0 = inlined_call_operand.vmem [shape: f32[8,2], index: 0, kind: input, shape index: {}]   ;;  %s155_s2 = inlined_call_operand.vmem [shape: f32[1,4], index: 2, kind: input, shape index: {}]   ;;  %s156_s3 = inlined_call_operand.vmem [shape: f32[8,4], index: 3, kind: output, shape index: {}]  }
   0x1   :  { %112 = vmatprep.subr.mxu0 %v119_v0  ;;  %v15_v1 = vld [vmem:[%s153_s1] sm:$0x3]  ;;  %114 = vmatprep.mubr.msk.f32.mxu0 %vm120_vm2, %v119_v0  ;;  %vm101_vm3 = vcmask 31744  }
   0x2   :  { %v14_v2 = vld [vmem:[%s154_s0] sm:$0xff]  ;;  %113 = vmatpush3.msk.msra.mxu0 %vm27_vm0, %v15_v1 }
   0x3   :  { %115 = vmatmul.mubr.msk.f32.vlgmr.msra.gmra.mrb[0].mxu0 %vm23_vm1, %v14_v2  ;;  %v107_v3 = vld [vmem:[%s155_s2] ss:$0 sm:$0xff] }
  0xd6   :  { %v97_v4 = vpop.f32.mrb[0].mxu0 }
  0xd7   :  { %v98_v5 = vadd.f32 %v107_v3, %v97_v4  ;;  %v116_v6 = vpop.f32.mrb[1].mxu0 }
  0xd9   :  { %102 = vst.msk [vmem:[%s156_s3] sm:$0xff] %vm101_vm3, %v98_v5 }

</bundles_post_ra>
